<compile_context>
chip_gen: v6e
topology: v6e:2x2x1
jax: 0.10.0
libtpu: 0.0.40
codegen_flags: <defaults>
</compile_context>

<pallas_src>
import functools

import jax
import jax.numpy as jnp
from jax import lax
from jax.experimental import pallas as pl
from jax.experimental.pallas import tpu as pltpu


def _round_up(x: int, m: int) -> int:
    return (x + m - 1) // m * m


def _cdiv(a: int, b: int) -> int:
    return (a + b - 1) // b


def _choose_tile(dim: int, hw: int, tile_max: int, min_exact: int = 512) -> int:
    """Pick a tile size (multiple of hw, <= tile_max) for a dimension `dim`.

    Prefers, in order:
      1. the whole (hw-rounded) dimension if it fits (single block),
      2. the largest tile <= tile_max that divides the hw-rounded dim exactly
         (no padding => no wrapper-side HBM copy of the operand),
      3. a balanced tile that minimizes padding.
    """
    d = _round_up(dim, hw)
    tile_max = max(hw, (tile_max // hw) * hw)
    if d <= tile_max:
        return d
    lo = max(hw, min(min_exact, tile_max))
    for t in range(tile_max, lo - 1, -hw):
        if d % t == 0:
            return t
    return _round_up(_cdiv(d, _cdiv(d, tile_max)), hw)


# --------------------------------------------------------------------------
# Kernels.  All compute x_tile @ w_tile.T on the MXU via dot_general that
# contracts the K (last) axis of both operands -- no weight transpose needed.
# --------------------------------------------------------------------------


def _dot_xt_wt(x_ref, w_ref):
    return lax.dot_general(
        x_ref[...],
        w_ref[...],
        dimension_numbers=(((1,), (1,)), ((), ())),
        preferred_element_type=jnp.float32,
    )


def _rpl_kernel_single_k(x_ref, w_ref, b_ref, o_ref):
    """Whole K contraction in one grid step: no scratch, no pl.when."""
    o_ref[...] = (_dot_xt_wt(x_ref, w_ref) + b_ref[...]).astype(o_ref.dtype)


def _rpl_kernel_multi_k_f32out(x_ref, w_ref, b_ref, o_ref):
    """Multi K steps, f32 output: accumulate directly into the resident
    output block (its block index is constant across k)."""
    k = pl.program_id(2)

    @pl.when(k == 0)
    def _():
        o_ref[...] = jnp.broadcast_to(b_ref[...], o_ref.shape)

    o_ref[...] += _dot_xt_wt(x_ref, w_ref)


def _rpl_kernel_multi_k_scratch(x_ref, w_ref, b_ref, o_ref, acc_ref):
    """Multi K steps, low-precision output: f32 scratch accumulator."""
    k = pl.program_id(2)

    @pl.when(k == 0)
    def _():
        acc_ref[...] = jnp.zeros_like(acc_ref)

    acc_ref[...] += _dot_xt_wt(x_ref, w_ref)

    @pl.when(k == pl.num_programs(2) - 1)
    def _():
        o_ref[...] = (acc_ref[...] + b_ref[...]).astype(o_ref.dtype)


# --------------------------------------------------------------------------
# Tiled pallas_call wrapper.
# --------------------------------------------------------------------------


@functools.partial(jax.jit, static_argnames=("tm", "tn", "tk", "vmem_limit"))
def _row_parallel_linear_2d(x2d, weight, bias_f32, *, tm, tn, tk, vmem_limit):
    """y2d = x2d @ weight.T + bias, tiled Pallas matmul."""
    M, K = x2d.shape
    N = weight.shape[0]
    out_dtype = x2d.dtype
    sz = x2d.dtype.itemsize

    M_pad = _round_up(M, tm)
    N_pad = _round_up(N, tn)
    K_pad = _round_up(K, tk)

    # Zero-pad up to the tile grid (a no-op for tile-multiple shapes, which
    # the tile selection below actively tries to guarantee).  Zero padding
    # along K contributes 0 to the contraction; padded M/N rows/cols are
    # sliced off at the end.
    if (M_pad, K_pad) != (M, K):
        x2d = jnp.pad(x2d, ((0, M_pad - M), (0, K_pad - K)))
    if (N_pad, K_pad) != (N, K):
        weight = jnp.pad(weight, ((0, N_pad - N), (0, K_pad - K)))
    if N_pad != N:
        bias_f32 = jnp.pad(bias_f32, ((0, 0), (0, N_pad - N)))

    gm, gn, gk = M_pad // tm, N_pad // tn, K_pad // tk

    # Bytes accounting includes re-streaming: x is read gn times, weight gm
    # times (each K sweep re-reads the streamed operand).
    cost = pl.CostEstimate(
        flops=2 * M_pad * N_pad * K_pad,
        transcendentals=0,
        bytes_accessed=(
            M_pad * K_pad * sz * gn
            + N_pad * K_pad * sz * gm
            + M_pad * N_pad * out_dtype.itemsize
            + N_pad * 4
        ),
    )

    if gk == 1:
        grid = (gm, gn)
        in_specs = [
            pl.BlockSpec((tm, tk), lambda i, j: (i, 0)),   # x tile
            pl.BlockSpec((tn, tk), lambda i, j: (j, 0)),   # weight tile (N, K)
            pl.BlockSpec((1, tn), lambda i, j: (0, j)),    # bias tile
        ]
        out_spec = pl.BlockSpec((tm, tn), lambda i, j: (i, j))
        kernel = _rpl_kernel_single_k
        scratch = []
        dims = ("parallel", "parallel")
    else:
        grid = (gm, gn, gk)
        in_specs = [
            pl.BlockSpec((tm, tk), lambda i, j, k: (i, k)),
            pl.BlockSpec((tn, tk), lambda i, j, k: (j, k)),
            pl.BlockSpec((1, tn), lambda i, j, k: (0, j)),
        ]
        out_spec = pl.BlockSpec((tm, tn), lambda i, j, k: (i, j))
        dims = ("parallel", "parallel", "arbitrary")
        if out_dtype == jnp.float32:
            kernel = _rpl_kernel_multi_k_f32out
            scratch = []
        else:
            kernel = _rpl_kernel_multi_k_scratch
            scratch = [pltpu.VMEM((tm, tn), jnp.float32)]

    out2d = pl.pallas_call(
        kernel,
        out_shape=jax.ShapeDtypeStruct((M_pad, N_pad), out_dtype),
        grid_spec=pltpu.PrefetchScalarGridSpec(
            num_scalar_prefetch=0,
            grid=grid,
            in_specs=in_specs,
            out_specs=out_spec,
            scratch_shapes=scratch,
        ),
        compiler_params=pltpu.CompilerParams(
            dimension_semantics=dims,
            vmem_limit_bytes=vmem_limit,
        ),
        cost_estimate=cost,
    )(x2d, weight, bias_f32)

    if (M_pad, N_pad) != (M, N):
        out2d = out2d[:M, :N]
    return out2d


@functools.lru_cache(maxsize=1)
def _hw_info():
    """(vmem_capacity_bytes, device_kind).  Conservative fallbacks."""
    vmem_cap = 64 << 20  # v7x-sized fallback: safe on every generation
    kind = ""
    try:
        kind = jax.devices()[0].device_kind.lower()
    except Exception:
        pass
    try:
        cap = getattr(pltpu.get_tpu_info(), "vmem_capacity_bytes", None)
        if cap:
            vmem_cap = int(cap)
    except Exception:
        pass
    return vmem_cap, kind


def row_parallel_linear(x, weight, bias=None, *, compute_dtype=None,
                        tm=None, tn=None, tk=None):
    """y = x @ weight.T + bias (RowParallelLinear forward, tp_size == 1).

    x:      (..., in_features)
    weight: (out_features, in_features)   (torch nn.Linear convention)
    bias:   (out_features,) or None
    compute_dtype: optional MXU feed dtype (e.g. jnp.bfloat16).  Accumulation
        is always f32; output is cast back to x's original dtype.
    tm/tn/tk: optional tile overrides (auto-selected from VMEM budget if None).
    """
    orig_shape = x.shape
    K = orig_shape[-1]
    N, Kw = weight.shape
    assert Kw == K, "weight in_features must match x last dim"

    out_dtype = x.dtype
    if compute_dtype is not None:
        x = x.astype(compute_dtype)
    weight = weight.astype(x.dtype)

    x2d = x.reshape(-1, K)
    M = x2d.shape[0]

    if bias is None:
        bias_f32 = jnp.zeros((1, N), jnp.float32)
    else:
        bias_f32 = bias.astype(jnp.float32).reshape(1, N)

    vmem_cap, kind = _hw_info()

    sz = jnp.dtype(x2d.dtype).itemsize
    out_sz = sz
    sublane = max(8, 32 // sz)  # 8 for f32, 16 for bf16, 32 for int8

    # Output-tile targets: ~1024x1024 clears the HBM:MXU ridge on v6e/v7x;
    # v5e's lower roofline is already met at 512, so spend its headroom on
    # larger K tiles (fewer grid steps) instead.
    if "v5" in kind and ("lite" in kind or "v5e" in kind):
        tm_target, tn_target = 512, 512
    else:
        tm_target, tn_target = 1024, 1024

    # VMEM working-set budget (double-buffered tiles + accumulator), kept
    # comfortably under the physical capacity of the current generation.
    budget = int(min(vmem_cap, 128 << 20) * 0.70)

    tm = _choose_tile(M, sublane, tm if tm is not None else tm_target)
    tn = _choose_tile(N, 128, tn if tn is not None else tn_target)

    # Megacore: v7x has 2 TensorCores that are fed by the parallel grid axes.
    # If the parallel grid degenerates to a single block (decode shapes),
    # split the N tile so both cores get work (harmless on single-core chips).
    N128 = _round_up(N, 128)
    if _cdiv(_round_up(M, sublane), tm) * _cdiv(N128, tn) < 2 and N128 >= 256:
        tn = max(128, (N128 // 2 // 128) * 128)

    # K tile: as large as the VMEM budget allows -- ideally the whole K so the
    # reduction axis collapses to one grid step (no accumulator traffic, no
    # per-step pipeline overhead).
    fixed = 2 * tm * tn * out_sz + tm * tn * 4 + 2 * tn * 4 + (1 << 20)
    avail = max(budget - fixed, 2 * (tm + tn) * sz * 128)
    tk_cap = max(128, avail // (2 * (tm + tn) * sz))
    tk = _choose_tile(K, 128, tk if tk is not None else tk_cap)

    gk = _cdiv(_round_up(K, 128), tk)
    needs_scratch = gk > 1 and jnp.dtype(x2d.dtype) != jnp.dtype(jnp.float32)
    needed = (
        2 * (tm * tk + tn * tk) * sz
        + 2 * tm * tn * out_sz
        + (tm * tn * 4 if needs_scratch else 0)
        + 2 * tn * 4
    )
    vmem_limit = int(min(max(needed + (4 << 20), 32 << 20),
                         int(min(vmem_cap, 128 << 20) * 0.92)))
    vmem_limit = max(vmem_limit, needed + (1 << 20))

    out2d = _row_parallel_linear_2d(
        x2d, weight, bias_f32, tm=int(tm), tn=int(tn), tk=int(tk),
        vmem_limit=int(vmem_limit),
    )
    out = out2d.reshape(*orig_shape[:-1], N)
    if out.dtype != out_dtype:
        out = out.astype(out_dtype)
    return out


if __name__ == "__main__":
    # Small shapes consistent with the module's forward:
    #   x: (batch=2, seq=8, in_features=256) -> y: (2, 8, out_features=128)
    batch, seq = 2, 8
    in_features, out_features = 256, 128

    key = jax.random.PRNGKey(0)
    kx, kw, kb = jax.random.split(key, 3)

    x = jax.random.normal(kx, (batch, seq, in_features), dtype=jnp.float32)
    # deterministic synthetic parameters (not loaded from a checkpoint)
    weight = (
        jax.random.normal(kw, (out_features, in_features), dtype=jnp.float32)
        * (1.0 / in_features ** 0.5)
    )
    bias = jax.random.normal(kb, (out_features,), dtype=jnp.float32) * 0.01

    # 1) default path (K collapses to a single grid step)
    y = row_parallel_linear(x, weight, bias)
    jax.block_until_ready(y)
    y_ref = jnp.einsum("bsk,nk->bsn", x, weight) + bias
    assert y.shape == (batch, seq, out_features)
    assert jnp.allclose(y, y_ref, atol=1e-4, rtol=1e-4)

    # 2) non-tile-multiple batch shape (padding / slicing path)
    x_odd = jax.random.normal(kx, (3, 5, in_features), dtype=jnp.float32)
    y_odd = row_parallel_linear(x_odd, weight, bias)
    jax.block_until_ready(y_odd)
    y_odd_ref = jnp.einsum("bsk,nk->bsn", x_odd, weight) + bias
    assert jnp.allclose(y_odd, y_odd_ref, atol=1e-4, rtol=1e-4)

    # 3) forced multi-step K reduction (f32: accumulates into the resident
    #    output block, no scratch)
    y_multi = row_parallel_linear(x, weight, bias, tk=128)
    jax.block_until_ready(y_multi)
    assert jnp.allclose(y_multi, y_ref, atol=1e-4, rtol=1e-4)

    # 4) bf16 fast path (MXU-native inputs, f32 scratch accumulator epilogue)
    x_bf = x.astype(jnp.bfloat16)
    w_bf = weight.astype(jnp.bfloat16)
    y_bf = row_parallel_linear(x_bf, w_bf, bias, tk=128)
    jax.block_until_ready(y_bf)
    y_bf_ref = jnp.einsum(
        "bsk,nk->bsn", x_bf.astype(jnp.float32), w_bf.astype(jnp.float32)
    ) + bias
    assert jnp.allclose(y_bf.astype(jnp.float32), y_bf_ref, atol=5e-2, rtol=5e-2)

    # 5) no-bias path
    y_nb = row_parallel_linear(x, weight, None)
    jax.block_until_ready(y_nb)
    assert jnp.allclose(
        y_nb, jnp.einsum("bsk,nk->bsn", x, weight), atol=1e-4, rtol=1e-4
    )

    print("KERNEL_OK")
</pallas_src>

<mosaic_0001>
module attributes {stable_mosaic.version = 11 : i64} {
  func.func @_rpl_kernel_single_k(%arg0: i32, %arg1: i32, %arg2: memref<16x256xf32, #tpu.memory_space<vmem>>, %arg3: memref<128x256xf32, #tpu.memory_space<vmem>>, %arg4: memref<1x128xf32, #tpu.memory_space<vmem>>, %arg5: memref<16x128xf32, #tpu.memory_space<vmem>>) attributes {dimension_semantics = [#tpu.dimension_semantics<parallel>, #tpu.dimension_semantics<parallel>], iteration_bounds = array<i64: 1, 1>, scalar_prefetch = 0 : i64, scratch_operands = 0 : i64, tpu.core_type = #tpu.core_type<tc>, window_params = [{transform_indices = @transform_0, window_bounds = array<i64: 16, 256>}, {transform_indices = @transform_1, window_bounds = array<i64: 128, 256>}, {transform_indices = @transform_2, window_bounds = array<i64: 1, 128>}, {transform_indices = @transform_3, window_bounds = array<i64: 16, 128>}]} {
    %c0 = arith.constant 0 : index
    %c0_0 = arith.constant 0 : index
    %0 = vector.load %arg2[%c0, %c0_0] : memref<16x256xf32, #tpu.memory_space<vmem>>, vector<16x256xf32>
    %c0_1 = arith.constant 0 : index
    %c0_2 = arith.constant 0 : index
    %1 = vector.load %arg3[%c0_1, %c0_2] : memref<128x256xf32, #tpu.memory_space<vmem>>, vector<128x256xf32>
    %cst = arith.constant dense<0.000000e+00> : vector<16x128xf32>
    %2 = tpu.matmul %0, %1, %cst {dimension_numbers = #tpu.dot_dimension_numbers<[1], [1], [0], [0], [0, 0, 1, 0], [], []>} : vector<16x256xf32>, vector<128x256xf32>, vector<16x128xf32> -> vector<16x128xf32>
    %c0_3 = arith.constant 0 : index
    %c0_4 = arith.constant 0 : index
    %3 = vector.load %arg4[%c0_3, %c0_4] : memref<1x128xf32, #tpu.memory_space<vmem>>, vector<1x128xf32>
    %4 = vector.broadcast %3 : vector<1x128xf32> to vector<16x128xf32>
    %5 = arith.addf %2, %4 : vector<16x128xf32>
    %c0_5 = arith.constant 0 : index
    %c0_6 = arith.constant 0 : index
    %6 = vector.load %arg5[%c0_5, %c0_6] : memref<16x128xf32, #tpu.memory_space<vmem>>, vector<16x128xf32>
    tpu.vector_store %arg5[%c0_5, %c0_6], %5 {strides = array<i32>} : memref<16x128xf32, #tpu.memory_space<vmem>>, vector<16x128xf32>,
    return
  }
  func.func @transform_0(%arg0: i32, %arg1: i32) -> (i32, i32) {
    %c0_i32 = arith.constant 0 : i32
    %c0_i32_0 = arith.constant 0 : i32
    return %arg0, %c0_i32 : i32, i32
  }
  func.func @transform_1(%arg0: i32, %arg1: i32) -> (i32, i32) {
    %c0_i32 = arith.constant 0 : i32
    %c0_i32_0 = arith.constant 0 : i32
    return %arg1, %c0_i32 : i32, i32
  }
  func.func @transform_2(%arg0: i32, %arg1: i32) -> (i32, i32) {
    %c0_i32 = arith.constant 0 : i32
    %c0_i32_0 = arith.constant 0 : i32
    return %c0_i32, %arg1 : i32, i32
  }
  func.func @transform_3(%arg0: i32, %arg1: i32) -> (i32, i32) {
    %c0_i32 = arith.constant 0 : i32
    return %arg0, %arg1 : i32, i32
  }
}

</mosaic_0001>

<bundles_post_ra>
// kernel: _row_parallel_linear_2d.1
= control target key start
LH: loop header
LB: loop body
LE: loop exit
PB: predicated region body
PF: predicated region fallthrough
CT: control target
= control target key end

     0   :  { %8 = vsyncpa [#allocation3], 0  ;;  %s326_s0 = inlined_call_operand.hbm [shape: f32[16,256], index: 0, kind: input, shape index: {}]   ;;  %s327_s1 = inlined_call_operand.hbm [shape: f32[128,256], index: 1, kind: input, shape index: {}]   ;;  %s328_s2 = inlined_call_operand.vmem [shape: f32[1,128], index: 2, kind: input, shape index: {}]   ;;  %s329_s3 = inlined_call_operand.hbm [shape: f32[16,128], index: 3, kind: output, shape index: {}]  }
   0x1   :  { %9 = vsyncpa [#allocation6], 0 }
   0x2   :  { %10 = vsyncpa [#allocation4], 0  ;;  %s287_s12 = smov [#allocation2]  }
   0x3   :  { %s16_s13 = sshll.u32 %s287_s12, 4  ;;  %s17_s13 = int_to_ptr.vmem [resolvable:$true] %s16_s13 }
   0x4   :  { %s229_s14 = scalar_lea.vmem %s17_s13, 512  ;;  %p234_p1 = scmp.lt.s32.totalorder %s17_s13, %s17_s13 }
   0x5   :  { %p230_p0 = scmp.ne.s32.totalorder %s17_s13, %s229_s14  ;;  %p235_p2 = scmp.lt.s32.totalorder %s229_s14, %s229_s14 }
   0x7   :  { %p236_p3 = por %p235_p2, %p234_p1 }
   0x9   :  { %p237_p4 = pnand %p236_p3, %p230_p0 }
   0xb   :  { %240 = shalt.err (!%p237_p4)
}
   0xc   :  { %s288_s15 = smov 256   ;;  %s289_s16 = smov 16  }
   0xd   :  { %22 = dma.hbm_to_vmem [thread:$0]  %s326_s0, 512, %s17_s13, [#allocation3], %s288_s15, %s288_s15, %s289_s16  }
   0xe   :  { %s290_s19 = smov [#allocation5]  }
   0xf   :  { %s28_s20 = sshll.u32 %s290_s19, 4  ;;  %s29_s20 = int_to_ptr.vmem [resolvable:$true] %s28_s20 }
  0x10   :  { %s249_s21 = scalar_lea.vmem %s29_s20, 4096  ;;  %p254_p6 = scmp.lt.s32.totalorder %s29_s20, %s29_s20 }
  0x11   :  { %p250_p5 = scmp.ne.s32.totalorder %s29_s20, %s249_s21  ;;  %p255_p7 = scmp.lt.s32.totalorder %s249_s21, %s249_s21 }
  0x13   :  { %p256_p8 = por %p255_p7, %p254_p6 }
  0x15   :  { %p257_p9 = pnand %p256_p8, %p250_p5 }
  0x17   :  { %260 = shalt.err (!%p257_p9)
}
  0x18   :  { %34 = dma.hbm_to_vmem [thread:$0]  %s327_s1, 4096, %s29_s20, [#allocation6], %s288_s15, %s288_s15, %s289_s16  }
  0x19   :  { %281 = dma.done.wait [#allocation3], 512  }
  0x1a   :  { %282 = vsyncadd [#allocation3], 4294966784 }
  0x1b   :  { %283 = dma.done.wait [#allocation6], 4096  }
  0x1c   :  { %284 = vsyncadd [#allocation6], 4294963200  ;;  %v78_v0 = vld [vmem:[#allocation5 + $0xf8] sm:$0xff]  ;;  %v77_v1 = vld [vmem:[#allocation5 + $0xf0] sm:$0xff]  ;;  %s291_s0 = smov [#allocation7]  }
  0x1d   :  { %v76_v2 = vld [vmem:[#allocation5 + $0xe8] sm:$0xff]  ;;  %86 = vmatprep.subr.mxu0 %v78_v0  ;;  %182 = vmatprep.subr.mxu1 %v78_v0  ;;  %v75_v3 = vld [vmem:[#allocation5 + $0xe0] sm:$0xff]  ;;  %v74_v4 = vld [vmem:[#allocation5 + $0xd8] sm:$0xff]  ;;  %s168_s1 = sshll.u32 %s291_s0, 4  ;;  %s169_s1 = int_to_ptr.vmem [resolvable:$true] %s168_s1 }
  0x1e   :  { %87 = vmatpush1.xpose.msra.mxu0 %v77_v1  ;;  %198 = vmatpush1.xpose.msra.mxu1 %v77_v1  ;;  %v73_v5 = vld [vmem:[#allocation5 + $0xd0] sm:$0xff]  ;;  %v72_v6 = vld [vmem:[#allocation5 + $0xc8] sm:$0xff]  ;;  %v71_v8 = vld [vmem:[#allocation5 + $0xc0] sm:$0xff]  ;;  %s261_s26 = scalar_lea.vmem %s169_s1, 256  ;;  %p266_p11 = scmp.lt.s32.totalorder %s169_s1, %s169_s1 }
  0x1f   :  { %88 = vmatprep.subr.mxu0 %v76_v2  ;;  %183 = vmatprep.subr.mxu1 %v76_v2  ;;  %v44_v7 = vld [vmem:[#allocation2 + $0x8] sm:$0xff]  ;;  %v46_v9 = vld [vmem:[#allocation2 + $0x18] sm:$0xff]  ;;  %v69_v11 = vld [vmem:[#allocation5 + $0xb0] sm:$0xff]  ;;  %p262_p10 = scmp.ne.s32.totalorder %s169_s1, %s261_s26  ;;  %p267_p12 = scmp.lt.s32.totalorder %s261_s26, %s261_s26 }
  0x20   :  { %v70_v10 = vld [vmem:[#allocation5 + $0xb8] sm:$0xff]  ;;  %150 = vmatprep.mubr.f32.mxu0 %v44_v7  ;;  %155 = vmatprep.mubr.f32.mxu1 %v46_v9  ;;  %v68_v12 = vld [vmem:[#allocation5 + $0xa8] sm:$0xff]  ;;  %v67_v13 = vld [vmem:[#allocation5 + $0xa0] sm:$0xff] }
  0x21   :  { %v66_v14 = vld [vmem:[#allocation5 + $0x98] sm:$0xff]  ;;  %v65_v15 = vld [vmem:[#allocation5 + $0x90] sm:$0xff]  ;;  %v64_v16 = vld [vmem:[#allocation5 + $0x88] sm:$0xff]  ;;  %p268_p13 = por %p267_p12, %p266_p11 }
  0x22   :  { %89 = vmatpush1.xpose.msra.mxu0 %v75_v3  ;;  %199 = vmatpush1.xpose.msra.mxu1 %v75_v3  ;;  %v63_v17 = vld [vmem:[#allocation5 + $0x80] sm:$0xff]  ;;  %v62_v18 = vld [vmem:[#allocation5 + $0x78] sm:$0xff]  ;;  %v61_v19 = vld [vmem:[#allocation5 + $0x70] sm:$0xff] }
  0x23   :  { %90 = vmatprep.subr.mxu0 %v74_v4  ;;  %184 = vmatprep.subr.mxu1 %v74_v4  ;;  %v60_v20 = vld [vmem:[#allocation5 + $0x68] sm:$0xff]  ;;  %v59_v21 = vld [vmem:[#allocation5 + $0x60] sm:$0xff]  ;;  %v58_v22 = vld [vmem:[#allocation5 + $0x58] sm:$0xff]  ;;  %p269_p0 = pnand %p268_p13, %p262_p10 }
  0x24   :  { %v57_v23 = vld [vmem:[#allocation5 + $0x50] sm:$0xff]  ;;  %v56_v24 = vld [vmem:[#allocation5 + $0x48] sm:$0xff]  ;;  %v55_v25 = vld [vmem:[#allocation5 + $0x40] sm:$0xff] }
  0x25   :  { %v54_v26 = vld [vmem:[#allocation5 + $0x38] sm:$0xff]  ;;  %v53_v27 = vld [vmem:[#allocation5 + $0x30] sm:$0xff]  ;;  %v52_v28 = vld [vmem:[#allocation5 + $0x28] sm:$0xff] }
  0x26   :  { %91 = vmatpush1.xpose.msra.mxu0 %v73_v5  ;;  %200 = vmatpush1.xpose.msra.mxu1 %v73_v5  ;;  %v51_v29 = vld [vmem:[#allocation5 + $0x20] sm:$0xff]  ;;  %v50_v30 = vld [vmem:[#allocation5 + $0x18] sm:$0xff]  ;;  %v49_v31 = vld [vmem:[#allocation5 + $0x10] sm:$0xff] }
  0x27   :  { %92 = vmatprep.subr.mxu0 %v72_v6  ;;  %185 = vmatprep.subr.mxu1 %v72_v6  ;;  %v48_v32 = vld [vmem:[#allocation5 + $0x8] sm:$0xff]  ;;  %v47_v33 = vld [vmem:[#allocation5] sm:$0xff]  ;;  %v45_v35 = vld [vmem:[#allocation2 + $0x10] sm:$0xff] }
  0x28   :  { %v43_v34 = vld [vmem:[#allocation2] sm:$0xff] }
  0x29   :  { %v181_v36 = vld [vmem:[%s328_s2] ss:$0 sm:$0xff] }
  0x2a   :  { %93 = vmatpush1.xpose.msra.mxu0 %v71_v8  ;;  %201 = vmatpush1.xpose.msra.mxu1 %v71_v8 }
  0x2b   :  { %94 = vmatprep.subr.mxu0 %v70_v10  ;;  %186 = vmatprep.subr.mxu1 %v70_v10 }
  0x2e   :  { %95 = vmatpush1.xpose.msra.mxu0 %v69_v11  ;;  %202 = vmatpush1.xpose.msra.mxu1 %v69_v11 }
  0x2f   :  { %96 = vmatprep.subr.mxu0 %v68_v12  ;;  %187 = vmatprep.subr.mxu1 %v68_v12 }
  0x32   :  { %97 = vmatpush1.xpose.msra.mxu0 %v67_v13  ;;  %203 = vmatpush1.xpose.msra.mxu1 %v67_v13 }
  0x33   :  { %98 = vmatprep.subr.mxu0 %v66_v14  ;;  %188 = vmatprep.subr.mxu1 %v66_v14 }
  0x36   :  { %99 = vmatpush1.xpose.msra.mxu0 %v65_v15  ;;  %204 = vmatpush1.xpose.msra.mxu1 %v65_v15 }
  0x37   :  { %100 = vmatprep.subr.mxu0 %v64_v16  ;;  %189 = vmatprep.subr.mxu1 %v64_v16 }
  0x3a   :  { %101 = vmatpush1.xpose.msra.mxu0 %v63_v17  ;;  %205 = vmatpush1.xpose.msra.mxu1 %v63_v17 }
  0x3b   :  { %102 = vmatprep.subr.mxu0 %v62_v18  ;;  %190 = vmatprep.subr.mxu1 %v62_v18 }
  0x3e   :  { %103 = vmatpush1.xpose.msra.mxu0 %v61_v19  ;;  %206 = vmatpush1.xpose.msra.mxu1 %v61_v19 }
  0x3f   :  { %104 = vmatprep.subr.mxu0 %v60_v20  ;;  %191 = vmatprep.subr.mxu1 %v60_v20 }
  0x42   :  { %105 = vmatpush1.xpose.msra.mxu0 %v59_v21  ;;  %207 = vmatpush1.xpose.msra.mxu1 %v59_v21 }
  0x43   :  { %106 = vmatprep.subr.mxu0 %v58_v22  ;;  %192 = vmatprep.subr.mxu1 %v58_v22 }
  0x46   :  { %107 = vmatpush1.xpose.msra.mxu0 %v57_v23  ;;  %208 = vmatpush1.xpose.msra.mxu1 %v57_v23 }
  0x47   :  { %108 = vmatprep.subr.mxu0 %v56_v24  ;;  %193 = vmatprep.subr.mxu1 %v56_v24 }
  0x4a   :  { %109 = vmatpush1.xpose.msra.mxu0 %v55_v25  ;;  %209 = vmatpush1.xpose.msra.mxu1 %v55_v25 }
  0x4b   :  { %110 = vmatprep.subr.mxu0 %v54_v26  ;;  %194 = vmatprep.subr.mxu1 %v54_v26 }
  0x4e   :  { %111 = vmatpush1.xpose.msra.mxu0 %v53_v27  ;;  %210 = vmatpush1.xpose.msra.mxu1 %v53_v27 }
  0x4f   :  { %112 = vmatprep.subr.mxu0 %v52_v28  ;;  %195 = vmatprep.subr.mxu1 %v52_v28 }
  0x52   :  { %113 = vmatpush1.xpose.msra.mxu0 %v51_v29  ;;  %211 = vmatpush1.xpose.msra.mxu1 %v51_v29 }
  0x53   :  { %114 = vmatprep.subr.mxu0 %v50_v30  ;;  %196 = vmatprep.subr.mxu1 %v50_v30 }
  0x56   :  { %115 = vmatpush1.xpose.msra.mxu0 %v49_v31  ;;  %212 = vmatpush1.xpose.msra.mxu1 %v49_v31 }
  0x57   :  { %116 = vmatprep.subr.mxu0 %v48_v32  ;;  %197 = vmatprep.subr.mxu1 %v48_v32 }
  0x5a   :  { %117 = vmatpush1.xpose.msra.mxu0 %v47_v33  ;;  %213 = vmatpush1.xpose.msra.mxu1 %v47_v33 }
  0x5d   :  { %151 = vmatmul.mubr.f32.vlgmr.msra.gmra.mxu0 %v43_v34  ;;  %156 = vmatmul.mubr.f32.vlgmr.msra.gmra.mxu1 %v45_v35 }
 0x11d   :  { %v152_v37 = vpop.f32.mrf.mxu0  ;;  %v157_v38 = vpop.f32.mrf.mxu1 }
 0x11e   :  { %v153_v39 = vadd.f32 %v181_v36, %v152_v37  ;;  %v158_v40 = vadd.f32 %v181_v36, %v157_v38 }
 0x11f   :  { %v154_v41 = vpop.f32.mrf.mxu0  ;;  %v159_v42 = vpop.f32.mrf.mxu1 }
 0x120   :  { %161 = vst [vmem:[#allocation7] sm:$0xff] %v153_v39  ;;  %162 = vst [vmem:[#allocation7 + $0x8] sm:$0xff] %v158_v40 }
 0x121   :  { %272 = shalt.err (!%p269_p0)
}
 0x122   :  { %s292_s27 = smov 128   ;;  %s293_s28 = smov 8  }
 0x123   :  { %174 = dma.vmem_to_hbm [thread:$0]  %s169_s1, 256, %s329_s3, [#allocation4], %s292_s27, %s292_s27, %s293_s28  }
 0x124   :  { %285 = dma.done.wait [#allocation4], 256  }
 0x125   :  { %286 = vsyncadd [#allocation4], 4294967040 }
 0x126   :  { %178 = vsyncpa [#allocation3], 1 }
 0x127   :  { %179 = vsyncpa [#allocation6], 1 }
 0x128   :  { %180 = vsyncpa [#allocation4], 1 }

</bundles_post_ra>
